<compile_context>
chip_gen: v6e
topology: v6e:2x2x1
jax: 0.10.0
libtpu: 0.0.40
codegen_flags: <defaults>
</compile_context>

<pallas_src>
import functools

import jax
import jax.numpy as jnp
from jax.experimental import pallas as pl
from jax.experimental.pallas import tpu as pltpu

GIN_EPS = 0.0    # GINConv default eps (train_eps=False)
BN_EPS = 1e-5    # nn.BatchNorm1d default eps
LANE = 128       # feature dims padded to lane width -> lane-dense stores
TILE = 128       # node-dim padding granularity

# Working-set gate for the fully fused single-call path. Kept comfortably under
# the 32 MiB scoped-VMEM default (v7x: 64 MiB physical / 32 MiB scoped) so the
# fused path never needs a vmem_limit override on any generation.
FUSED_WS_BUDGET_BYTES = 12 * (1 << 20)


# --------------------------------------------------------------------------- #
# Fused single-pallas_call path (small / medium graphs)
# --------------------------------------------------------------------------- #
def _gin_fused_kernel(x_ref, adj_ref, w1_ref, b1_ref, w2_ref, b2_ref, o_ref):
    """Whole forward pass with all operands resident in VMEM."""
    # layer 1: h = relu(A_hat @ (x @ W1') + b1')   (BN already folded into W1'/b1')
    xw1 = jnp.dot(x_ref[...], w1_ref[...], preferred_element_type=jnp.float32)
    h = jnp.dot(adj_ref[...], xw1.astype(jnp.bfloat16),
                preferred_element_type=jnp.float32) + b1_ref[...]
    h = jnp.maximum(h, 0.0)
    # NOTE: padded rows of h equal relu(b1) != 0; harmless because A_hat's padded
    # columns are zero and padded output rows are sliced off on the host.
    # layer 2 (dropout is identity in eval mode): out = A_hat @ (h @ W2) + b2
    xw2 = jnp.dot(h.astype(jnp.bfloat16), w2_ref[...],
                  preferred_element_type=jnp.float32)
    out = jnp.dot(adj_ref[...], xw2.astype(jnp.bfloat16),
                  preferred_element_type=jnp.float32) + b2_ref[...]
    o_ref[...] = out.astype(o_ref.dtype)


def _gin_fused(x_bf, adj_bf, w1_bf, b1, w2_bf, b2):
    Np = x_bf.shape[0]
    Cp = w2_bf.shape[1]
    vmem = pl.BlockSpec(memory_space=pltpu.MemorySpace.VMEM)
    return pl.pallas_call(
        _gin_fused_kernel,
        out_shape=jax.ShapeDtypeStruct((Np, Cp), jnp.float32),
        in_specs=[vmem] * 6,
        out_specs=vmem,
    )(x_bf, adj_bf, w1_bf, b1, w2_bf, b2)


# --------------------------------------------------------------------------- #
# Tiled path (larger graphs)
# --------------------------------------------------------------------------- #
def _proj_kernel_direct(a_ref, b_ref, o_ref):
    # K fits in a single tile: no f32 accumulator round trip, no pl.when.
    o_ref[...] = jnp.dot(a_ref[...], b_ref[...],
                         preferred_element_type=jnp.float32).astype(o_ref.dtype)


def _proj_kernel_acc(a_ref, b_ref, o_ref, acc_ref):
    @pl.when(pl.program_id(2) == 0)
    def _init():
        acc_ref[...] = jnp.zeros_like(acc_ref)

    acc_ref[...] += jnp.dot(a_ref[...], b_ref[...],
                            preferred_element_type=jnp.float32)

    @pl.when(pl.program_id(2) == pl.num_programs(2) - 1)
    def _finalize():
        o_ref[...] = acc_ref[...].astype(o_ref.dtype)


def _tiled_proj(a, b, *, out_dtype, tm, tk, tn):
    """out = a @ b, tiled; both operands expected bf16, accumulation f32."""
    M, K = a.shape
    K2, N = b.shape
    assert K == K2 and M % tm == 0 and K % tk == 0 and N % tn == 0
    grid = (M // tm, N // tn, K // tk)
    in_specs = [pl.BlockSpec((tm, tk), lambda i, j, k: (i, k)),
                pl.BlockSpec((tk, tn), lambda i, j, k: (k, j))]
    out_specs = pl.BlockSpec((tm, tn), lambda i, j, k: (i, j))
    params = pltpu.CompilerParams(
        dimension_semantics=("parallel", "parallel", "arbitrary"))
    if grid[2] == 1:
        return pl.pallas_call(
            _proj_kernel_direct,
            out_shape=jax.ShapeDtypeStruct((M, N), out_dtype),
            grid=grid, in_specs=in_specs, out_specs=out_specs,
            compiler_params=params,
        )(a, b)
    return pl.pallas_call(
        _proj_kernel_acc,
        out_shape=jax.ShapeDtypeStruct((M, N), out_dtype),
        grid=grid, in_specs=in_specs, out_specs=out_specs,
        scratch_shapes=[pltpu.VMEM((tm, tn), jnp.float32)],
        compiler_params=params,
    )(a, b)


def _agg_relu_proj_kernel(adj_ref, xw_ref, b_ref, w2_ref, o_ref, acc_ref):
    """o = relu(adj @ xw + b) @ w2 ; h@W2 fused into the finalize epilogue."""
    k = pl.program_id(1)

    @pl.when(k == 0)
    def _init():
        acc_ref[...] = jnp.zeros_like(acc_ref)

    acc_ref[...] += jnp.dot(adj_ref[...], xw_ref[...],
                            preferred_element_type=jnp.float32)

    @pl.when(k == pl.num_programs(1) - 1)
    def _finalize():
        h = jnp.maximum(acc_ref[...] + b_ref[...], 0.0)
        o_ref[...] = jnp.dot(h.astype(jnp.bfloat16), w2_ref[...],
                             preferred_element_type=jnp.float32).astype(o_ref.dtype)


def _agg_bias_kernel(adj_ref, xw_ref, b_ref, o_ref, acc_ref):
    """o = adj @ xw + b."""
    k = pl.program_id(1)

    @pl.when(k == 0)
    def _init():
        acc_ref[...] = jnp.zeros_like(acc_ref)

    acc_ref[...] += jnp.dot(adj_ref[...], xw_ref[...],
                            preferred_element_type=jnp.float32)

    @pl.when(k == pl.num_programs(1) - 1)
    def _finalize():
        o_ref[...] = (acc_ref[...] + b_ref[...]).astype(o_ref.dtype)


def _agg_relu_proj(adj, xw, b, w2, *, tm, tk):
    M, K = adj.shape
    H = xw.shape[1]
    C = w2.shape[1]
    assert M % tm == 0 and K % tk == 0
    return pl.pallas_call(
        _agg_relu_proj_kernel,
        out_shape=jax.ShapeDtypeStruct((M, C), jnp.bfloat16),
        grid=(M // tm, K // tk),
        in_specs=[
            pl.BlockSpec((tm, tk), lambda i, k: (i, k)),
            pl.BlockSpec((tk, H), lambda i, k: (k, 0)),
            pl.BlockSpec((1, H), lambda i, k: (0, 0)),    # bias: resident
            pl.BlockSpec((H, C), lambda i, k: (0, 0)),    # W2: resident (~32 KiB bf16)
        ],
        out_specs=pl.BlockSpec((tm, C), lambda i, k: (i, 0)),
        scratch_shapes=[pltpu.VMEM((tm, H), jnp.float32)],
        compiler_params=pltpu.CompilerParams(
            dimension_semantics=("parallel", "arbitrary")),
    )(adj, xw, b, w2)


def _agg_bias(adj, xw, b, *, tm, tk, out_dtype):
    M, K = adj.shape
    C = xw.shape[1]
    assert M % tm == 0 and K % tk == 0
    return pl.pallas_call(
        _agg_bias_kernel,
        out_shape=jax.ShapeDtypeStruct((M, C), out_dtype),
        grid=(M // tm, K // tk),
        in_specs=[
            pl.BlockSpec((tm, tk), lambda i, k: (i, k)),
            pl.BlockSpec((tk, C), lambda i, k: (k, 0)),
            pl.BlockSpec((1, C), lambda i, k: (0, 0)),
        ],
        out_specs=pl.BlockSpec((tm, C), lambda i, k: (i, 0)),
        scratch_shapes=[pltpu.VMEM((tm, C), jnp.float32)],
        compiler_params=pltpu.CompilerParams(
            dimension_semantics=("parallel", "arbitrary")),
    )(adj, xw, b)


def _pick_tm(np_):
    # 256-row tiles fill the v6e/v7x 256x256 MXU, but keep >= 2 row tiles so the
    # "parallel" row axis can shard across v7x's two TensorCores.
    return 256 if (np_ % 256 == 0 and np_ // 256 >= 2) else 128


def _pick_tk(k):
    # Largest reduction tile <= 2048 that divides k (k is a multiple of 128):
    # big DMA chunks and few 0.35us grid steps in the memory-bound aggregation.
    for t in (2048, 1024, 512, 256, 128):
        if k % t == 0:
            return t
    return 128


def _gin_tiled(x_bf, adj_bf, w1_bf, b1, w2_bf, b2):
    Np, Fp = x_bf.shape
    Hp = w1_bf.shape[1]
    tm = _pick_tm(Np)
    tk_agg = _pick_tk(Np)
    # 1) projection: xw1 = x @ W1'  (acc scratch skipped when Fp fits one tile)
    xw1 = _tiled_proj(x_bf, w1_bf, out_dtype=jnp.bfloat16,
                      tm=tm, tk=_pick_tk(Fp), tn=Hp)
    # 2) fused aggregation + epilogue projection: xw2 = relu(A_hat@xw1 + b1) @ W2
    #    (h never materializes in HBM)
    xw2 = _agg_relu_proj(adj_bf, xw1, b1, w2_bf, tm=tm, tk=tk_agg)
    # 3) final aggregation: out = A_hat @ xw2 + b2
    return _agg_bias(adj_bf, xw2, b2, tm=tm, tk=tk_agg, out_dtype=jnp.float32)


# --------------------------------------------------------------------------- #
# Host-side wrapper
# --------------------------------------------------------------------------- #
def _round_up(n, m):
    return (n + m - 1) // m * m


def _pad2(a, rows, cols):
    return jnp.pad(a, ((0, rows - a.shape[0]), (0, cols - a.shape[1])))


def gin_forward(x, adj, params, *, force_tiled=False):
    """GIN forward pass (eval mode).

    x:   [N, nfeat] float32 node features
    adj: [N, N] float32 dense adjacency, adj[dst, src] = edge multiplicity
    """
    N, nfeat = x.shape
    nhid = params["w1"].shape[1]
    nclass = params["w2"].shape[1]

    # Fold eval-mode BatchNorm into the first linear layer:
    #   BN(z) = (z - rmean) * s + beta,   s = gamma / sqrt(rvar + eps)
    s = params["gamma"] * jax.lax.rsqrt(params["rvar"] + BN_EPS)       # [1, nhid]
    w1_f = params["w1"] * s                                            # [nfeat, nhid]
    b1_f = (params["b1"] - params["rmean"]) * s + params["beta"]       # [1, nhid]

    # Fold the GIN self term into the adjacency: A_hat = A + (1+eps) I.
    adj_hat = adj + (1.0 + GIN_EPS) * jnp.eye(N, dtype=adj.dtype)

    Np = _round_up(N, TILE)
    Fp = _round_up(nfeat, LANE)
    Hp = _round_up(nhid, LANE)
    Cp = _round_up(nclass, LANE)

    # bf16 operands on BOTH sides of every matmul -> native bf16 MXU path on
    # v5e/v6e/v7x; all accumulation stays f32 via preferred_element_type.
    # NOTE: bf16 adjacency is exact only while edge multiplicities (+1 self term)
    # stay <= 256 (bf16 integer-exact range) — true for this test graph.
    x_bf = _pad2(x, Np, Fp).astype(jnp.bfloat16)
    adj_bf = _pad2(adj_hat, Np, Np).astype(jnp.bfloat16)
    w1_bf = _pad2(w1_f, Fp, Hp).astype(jnp.bfloat16)
    w2_bf = _pad2(params["w2"], Hp, Cp).astype(jnp.bfloat16)
    b1_p = _pad2(b1_f, 1, Hp)
    b2_p = _pad2(params["b2"], 1, Cp)

    # Working set of the fully fused path (bf16 operands + f32 intermediates).
    ws = 2 * (Np * Np + Np * Fp + Fp * Hp + Hp * Cp) \
        + 4 * (2 * Np * Hp + 2 * Np * Cp)
    if (not force_tiled) and ws <= FUSED_WS_BUDGET_BYTES:
        out = _gin_fused(x_bf, adj_bf, w1_bf, b1_p, w2_bf, b2_p)
    else:
        out = _gin_tiled(x_bf, adj_bf, w1_bf, b1_p, w2_bf, b2_p)

    return out[:N, :nclass]


def gin_forward_ref(x, adj, p):
    """Pure-JAX float32 reference (module semantics, eval mode)."""
    h = (1.0 + GIN_EPS) * x + adj @ x
    h = h @ p["w1"] + p["b1"]
    h = (h - p["rmean"]) * jax.lax.rsqrt(p["rvar"] + BN_EPS) * p["gamma"] + p["beta"]
    h = jnp.maximum(h, 0.0)
    h2 = (1.0 + GIN_EPS) * h + adj @ h
    return h2 @ p["w2"] + p["b2"]


if __name__ == "__main__":
    # Small, deterministic problem: N nodes, nfeat -> nhid -> nclass, E edges.
    N, nfeat, nhid, nclass, E = 256, 48, 64, 10, 1024

    key = jax.random.PRNGKey(0)
    ks = jax.random.split(key, 12)

    # Node features.
    x = jax.random.normal(ks[0], (N, nfeat), dtype=jnp.float32)

    # Random edge_index [2, E] densified to an adjacency matrix (plain-JAX glue).
    # TODO(synk): sparse (CSR / scalar-prefetch gather) aggregation for E << N^2 graphs.
    src = jax.random.randint(ks[1], (E,), 0, N)
    dst = jax.random.randint(ks[2], (E,), 0, N)
    adj = jnp.zeros((N, N), jnp.float32).at[dst, src].add(1.0)

    # GINConv 0: Linear(nfeat, nhid) stored as [in, out] (PyTorch computes x @ W^T).
    w1 = jax.random.normal(ks[3], (nfeat, nhid), jnp.float32) / jnp.sqrt(float(nfeat))
    b1 = 0.1 * jax.random.normal(ks[4], (1, nhid), jnp.float32)

    # BatchNorm1d(nhid) parameters + running stats (deterministic, non-trivial).
    gamma = 1.0 + 0.1 * jax.random.normal(ks[5], (1, nhid), jnp.float32)
    beta = 0.1 * jax.random.normal(ks[6], (1, nhid), jnp.float32)
    rmean = 0.1 * jax.random.normal(ks[7], (1, nhid), jnp.float32)
    rvar = 0.5 + jax.random.uniform(ks[8], (1, nhid), jnp.float32)

    # GINConv last: Linear(nhid, nclass).
    w2 = jax.random.normal(ks[9], (nhid, nclass), jnp.float32) / jnp.sqrt(float(nhid))
    b2 = 0.1 * jax.random.normal(ks[10], (1, nclass), jnp.float32)

    params = dict(w1=w1, b1=b1, gamma=gamma, beta=beta,
                  rmean=rmean, rvar=rvar, w2=w2, b2=b2)

    ref = gin_forward_ref(x, adj, params)

    # Fused single-call path (taken automatically at this size).
    out = jax.block_until_ready(gin_forward(x, adj, params))
    assert out.shape == (N, nclass)
    assert jnp.allclose(out, ref, atol=5e-1, rtol=5e-2), "fused path mismatch vs ref"

    # Tiled multi-call path (what large graphs would use) — exercised for coverage.
    out_t = jax.block_until_ready(gin_forward(x, adj, params, force_tiled=True))
    assert out_t.shape == (N, nclass)
    assert jnp.allclose(out_t, ref, atol=5e-1, rtol=5e-2), "tiled path mismatch vs ref"

    print("KERNEL_OK")
</pallas_src>

<mosaic_0001>
module attributes {stable_mosaic.version = 11 : i64} {
  func.func @_gin_fused_kernel(%arg0: memref<256x128xbf16, #tpu.memory_space<vmem>>, %arg1: memref<256x256xbf16, #tpu.memory_space<vmem>>, %arg2: memref<128x128xbf16, #tpu.memory_space<vmem>>, %arg3: memref<1x128xf32, #tpu.memory_space<vmem>>, %arg4: memref<128x128xbf16, #tpu.memory_space<vmem>>, %arg5: memref<1x128xf32, #tpu.memory_space<vmem>>, %arg6: memref<256x128xf32, #tpu.memory_space<vmem>>) attributes {dimension_semantics = [], scalar_prefetch = 0 : i64, scratch_operands = 0 : i64, tpu.core_type = #tpu.core_type<tc>} {
    %c0 = arith.constant 0 : index
    %c0_0 = arith.constant 0 : index
    %0 = vector.load %arg0[%c0, %c0_0] : memref<256x128xbf16, #tpu.memory_space<vmem>>, vector<256x128xbf16>
    %c0_1 = arith.constant 0 : index
    %c0_2 = arith.constant 0 : index
    %1 = vector.load %arg2[%c0_1, %c0_2] : memref<128x128xbf16, #tpu.memory_space<vmem>>, vector<128x128xbf16>
    %cst = arith.constant dense<0.000000e+00> : vector<256x128xf32>
    %2 = tpu.matmul %0, %1, %cst {dimension_numbers = #tpu.dot_dimension_numbers<[1], [0], [0], [1], [0, 0, 1, 1], [], []>} : vector<256x128xbf16>, vector<128x128xbf16>, vector<256x128xf32> -> vector<256x128xf32>
    %c0_3 = arith.constant 0 : index
    %c0_4 = arith.constant 0 : index
    %3 = vector.load %arg1[%c0_3, %c0_4] : memref<256x256xbf16, #tpu.memory_space<vmem>>, vector<256x256xbf16>
    %4 = arith.truncf %2 : vector<256x128xf32> to vector<256x128xbf16>
    %cst_5 = arith.constant dense<0.000000e+00> : vector<256x128xf32>
    %5 = tpu.matmul %3, %4, %cst_5 {dimension_numbers = #tpu.dot_dimension_numbers<[1], [0], [0], [1], [0, 0, 1, 1], [], []>} : vector<256x256xbf16>, vector<256x128xbf16>, vector<256x128xf32> -> vector<256x128xf32>
    %c0_6 = arith.constant 0 : index
    %c0_7 = arith.constant 0 : index
    %6 = vector.load %arg3[%c0_6, %c0_7] : memref<1x128xf32, #tpu.memory_space<vmem>>, vector<1x128xf32>
    %7 = vector.broadcast %6 : vector<1x128xf32> to vector<256x128xf32>
    %8 = arith.addf %5, %7 : vector<256x128xf32>
    %cst_8 = arith.constant 0.000000e+00 : f32
    %9 = vector.broadcast %cst_8 : f32 to vector<256x128xf32>
    %10 = arith.maximumf %8, %9 : vector<256x128xf32>
    %11 = arith.truncf %10 : vector<256x128xf32> to vector<256x128xbf16>
    %c0_9 = arith.constant 0 : index
    %c0_10 = arith.constant 0 : index
    %12 = vector.load %arg4[%c0_9, %c0_10] : memref<128x128xbf16, #tpu.memory_space<vmem>>, vector<128x128xbf16>
    %cst_11 = arith.constant dense<0.000000e+00> : vector<256x128xf32>
    %13 = tpu.matmul %11, %12, %cst_11 {dimension_numbers = #tpu.dot_dimension_numbers<[1], [0], [0], [1], [0, 0, 1, 1], [], []>} : vector<256x128xbf16>, vector<128x128xbf16>, vector<256x128xf32> -> vector<256x128xf32>
    %c0_12 = arith.constant 0 : index
    %c0_13 = arith.constant 0 : index
    %14 = vector.load %arg1[%c0_12, %c0_13] : memref<256x256xbf16, #tpu.memory_space<vmem>>, vector<256x256xbf16>
    %15 = arith.truncf %13 : vector<256x128xf32> to vector<256x128xbf16>
    %cst_14 = arith.constant dense<0.000000e+00> : vector<256x128xf32>
    %16 = tpu.matmul %14, %15, %cst_14 {dimension_numbers = #tpu.dot_dimension_numbers<[1], [0], [0], [1], [0, 0, 1, 1], [], []>} : vector<256x256xbf16>, vector<256x128xbf16>, vector<256x128xf32> -> vector<256x128xf32>
    %c0_15 = arith.constant 0 : index
    %c0_16 = arith.constant 0 : index
    %17 = vector.load %arg5[%c0_15, %c0_16] : memref<1x128xf32, #tpu.memory_space<vmem>>, vector<1x128xf32>
    %18 = vector.broadcast %17 : vector<1x128xf32> to vector<256x128xf32>
    %19 = arith.addf %16, %18 : vector<256x128xf32>
    %c0_17 = arith.constant 0 : index
    %c0_18 = arith.constant 0 : index
    %20 = vector.load %arg6[%c0_17, %c0_18] : memref<256x128xf32, #tpu.memory_space<vmem>>, vector<256x128xf32>
    tpu.vector_store %arg6[%c0_17, %c0_18], %19 {strides = array<i32>} : memref<256x128xf32, #tpu.memory_space<vmem>>, vector<256x128xf32>,
    return
  }
}

</mosaic_0001>

<bundles_post_ra>
// kernel: tpu_custom_call.1
= control target key start
LH: loop header
LB: loop body
LE: loop exit
PB: predicated region body
PF: predicated region fallthrough
CT: control target
= control target key end

     0   :  { %11 = vsyncpa [#allocation3], 0  ;;  %s2227_s0 = inlined_call_operand.hbm [shape: bf16[256,128], index: 0, kind: input, shape index: {}]   ;;  %s2228_s1 = inlined_call_operand.hbm [shape: bf16[256,256], index: 1, kind: input, shape index: {}]   ;;  %s2229_s2 = inlined_call_operand.hbm [shape: bf16[128,128], index: 2, kind: input, shape index: {}]   ;;  %s2230_s3 = inlined_call_operand.vmem [shape: f32[1,128], index: 3, kind: input, shape index: {}]   ;;  %s2231_s4 = inlined_call_operand.hbm [shape: bf16[128,128], index: 4, kind: input, shape index: {}]   ;;  %s2232_s5 = inlined_call_operand.vmem [shape: f32[1,128], index: 5, kind: input, shape index: {}]   ;;  %s2233_s6 = inlined_call_operand.hbm [shape: f32[256,128], index: 6, kind: output, shape index: {}]  }
   0x1   :  { %12 = vsyncpa [#allocation6], 0 }
   0x2   :  { %13 = vsyncpa [#allocation9], 0 }
   0x3   :  { %14 = vsyncpa [#allocation4], 0  ;;  %s1948_s21 = smov [#allocation5]  }
   0x4   :  { %s32_s22 = sshll.u32 %s1948_s21, 4  ;;  %s33_s22 = int_to_ptr.vmem [resolvable:$true] %s32_s22 }
   0x5   :  { %s1848_s23 = scalar_lea.vmem %s33_s22, 4096  ;;  %p1853_p1 = scmp.lt.s32.totalorder %s33_s22, %s33_s22 }
   0x6   :  { %p1849_p0 = scmp.ne.s32.totalorder %s33_s22, %s1848_s23  ;;  %p1854_p2 = scmp.lt.s32.totalorder %s1848_s23, %s1848_s23 }
   0x8   :  { %p1855_p3 = por %p1854_p2, %p1853_p1 }
   0xa   :  { %p1856_p4 = pnand %p1855_p3, %p1849_p0 }
   0xc   :  { %1859 = shalt.err (!%p1856_p4)
}
   0xd   :  { %s1949_s24 = smov 128   ;;  %s1950_s25 = smov 8  }
   0xe   :  { %38 = dma.hbm_to_vmem [thread:$0]  %s2228_s1, 4096, %s33_s22, [#allocation6], %s1949_s24, %s1949_s24, %s1950_s25  }
   0xf   :  { %s1951_s28 = smov [#allocation2]  }
  0x10   :  { %s20_s29 = sshll.u32 %s1951_s28, 4  ;;  %s21_s29 = int_to_ptr.vmem [resolvable:$true] %s20_s29 }
  0x11   :  { %s1868_s30 = scalar_lea.vmem %s21_s29, 2048  ;;  %p1873_p6 = scmp.lt.s32.totalorder %s21_s29, %s21_s29 }
  0x12   :  { %p1869_p5 = scmp.ne.s32.totalorder %s21_s29, %s1868_s30  ;;  %p1874_p7 = scmp.lt.s32.totalorder %s1868_s30, %s1868_s30 }
  0x14   :  { %p1875_p8 = por %p1874_p7, %p1873_p6 }
  0x16   :  { %p1876_p9 = pnand %p1875_p8, %p1869_p5 }
  0x18   :  { %1879 = shalt.err (!%p1876_p9)
}
  0x19   :  { %s1952_s7 = smov 64   ;;  %s1953_s8 = smov 4  }
  0x1a   :  { %26 = dma.hbm_to_vmem [thread:$0]  %s2227_s0, 2048, %s21_s29, [#allocation3], %s1952_s7, %s1952_s7, %s1953_s8  }
  0x1b   :  { %s1954_s11 = smov [#allocation7]   ;;  %s1955_s13 = smov [#allocation8]  }
  0x1c   :  { %s44_s12 = sshll.u32 %s1954_s11, 4  ;;  %s58_s1 = sshll.u32 %s1955_s13, 4  ;;  %s45_s12 = int_to_ptr.vmem [resolvable:$true] %s44_s12  ;;  %s59_s1 = int_to_ptr.vmem [resolvable:$true] %s58_s1 }
  0x1d   :  { %s1888_s14 = scalar_lea.vmem %s45_s12, 1024  ;;  %p1893_p11 = scmp.lt.s32.totalorder %s45_s12, %s45_s12 }
  0x1e   :  { %p1889_p10 = scmp.ne.s32.totalorder %s45_s12, %s1888_s14  ;;  %p1894_p12 = scmp.lt.s32.totalorder %s1888_s14, %s1888_s14 }
  0x20   :  { %p1895_p13 = por %p1894_p12, %p1893_p11 }
  0x22   :  { %p1896_p0 = pnand %p1895_p13, %p1889_p10 }
  0x24   :  { %1899 = shalt.err (!%p1896_p0)
}
  0x25   :  { %50 = dma.hbm_to_vmem [thread:$0]  %s2229_s2, 1024, %s45_s12, [#allocation6], %s1952_s7, %s1952_s7, %s1953_s8  }
  0x26   :  { %s1908_s17 = scalar_lea.vmem %s59_s1, 1024  ;;  %p1913_p2 = scmp.lt.s32.totalorder %s59_s1, %s59_s1 }
  0x27   :  { %p1909_p1 = scmp.ne.s32.totalorder %s59_s1, %s1908_s17  ;;  %p1914_p3 = scmp.lt.s32.totalorder %s1908_s17, %s1908_s17 }
  0x29   :  { %p1915_p4 = por %p1914_p3, %p1913_p2 }
  0x2b   :  { %p1916_p5 = pnand %p1915_p4, %p1909_p1 }
  0x2d   :  { %1919 = shalt.err (!%p1916_p5)
}
  0x2e   :  { %64 = dma.hbm_to_vmem [thread:$0]  %s2231_s4, 1024, %s59_s1, [#allocation9], %s1952_s7, %s1952_s7, %s1953_s8  }
  0x2f   :  { %1940 = dma.done.wait [#allocation3], 2048  }
  0x30   :  { %1941 = vsyncadd [#allocation3], 4294965248 }
  0x31   :  { %1942 = dma.done.wait [#allocation6], 5120  }
  0x32   :  { %1943 = vsyncadd [#allocation6], 4294962176 }
  0x33   :  { %1944 = dma.done.wait [#allocation9], 1024  }
  0x34   :  { %1945 = vsyncadd [#allocation9], 4294966272  ;;  %v1760_v0 = vld [vmem:[#allocation7 + $0x38] sm:$0xff]   ;;  %v1761_v1 = vld [vmem:[#allocation7 + $0x30] sm:$0xff]  }
  0x35   :  { %1655 = vmatprep.subr.bf16.mxu1 %v1760_v0  ;;  %v1762_v2 = vld [vmem:[#allocation7 + $0x28] sm:$0xff]   ;;  %v1763_v3 = vld [vmem:[#allocation7 + $0x20] sm:$0xff]   ;;  %v1764_v5 = vld [vmem:[#allocation7 + $0x18] sm:$0xff]  }
  0x36   :  { %1656 = vmatpush3.bf16.msra.mxu1 %v1760_v0  ;;  %v1768_v4 = vld [vmem:[#allocation2] sm:$0xff]   ;;  %v1765_v6 = vld [vmem:[#allocation7 + $0x10] sm:$0xff]   ;;  %v1766_v7 = vld [vmem:[#allocation7 + $0x8] sm:$0xff]  }
  0x37   :  { %1657 = vmatprep.subr.bf16.mxu1 %v1761_v1  ;;  %1671 = vmatprep.mubr.bf16.mxu1 %v1768_v4  ;;  %v1767_v8 = vld [vmem:[#allocation7] sm:$0xff]   ;;  %v1769_v9 = vld [vmem:[#allocation2 + $0x8] sm:$0xff]   ;;  %v1770_v10 = vld [vmem:[#allocation2 + $0x10] sm:$0xff]  }
  0x38   :  { %v1771_v11 = vld [vmem:[#allocation2 + $0x18] sm:$0xff]   ;;  %v1772_v12 = vld [vmem:[#allocation2 + $0x20] sm:$0xff]   ;;  %v1773_v13 = vld [vmem:[#allocation2 + $0x28] sm:$0xff]  }
  0x39   :  { %v1774_v14 = vld [vmem:[#allocation2 + $0x30] sm:$0xff]   ;;  %v1775_v15 = vld [vmem:[#allocation2 + $0x38] sm:$0xff]   ;;  %v1776_v16 = vld [vmem:[#allocation2 + $0x40] sm:$0xff]  }
  0x3a   :  { %1658 = vmatpush3.bf16.msra.mxu1 %v1761_v1  ;;  %v1777_v17 = vld [vmem:[#allocation2 + $0x48] sm:$0xff]   ;;  %v1778_v18 = vld [vmem:[#allocation2 + $0x50] sm:$0xff]   ;;  %v1779_v19 = vld [vmem:[#allocation2 + $0x58] sm:$0xff]  }
  0x3b   :  { %1659 = vmatprep.subr.bf16.mxu1 %v1762_v2  ;;  %v1780_v20 = vld [vmem:[#allocation2 + $0x60] sm:$0xff]   ;;  %v1781_v21 = vld [vmem:[#allocation2 + $0x68] sm:$0xff]   ;;  %v1782_v22 = vld [vmem:[#allocation2 + $0x70] sm:$0xff]  }
  0x3c   :  { %v1783_v23 = vld [vmem:[#allocation2 + $0x78] sm:$0xff]   ;;  %v2007_v24 = vld [vmem:[#allocation5 + $0x4] ss:$8 sps:$4 sm:$0xff]  }
  0x3e   :  { %1660 = vmatpush3.bf16.msra.mxu1 %v1762_v2 }
  0x3f   :  { %1661 = vmatprep.subr.bf16.mxu1 %v1763_v3 }
  0x42   :  { %1662 = vmatpush3.bf16.msra.mxu1 %v1763_v3 }
  0x43   :  { %1663 = vmatprep.subr.bf16.mxu1 %v1764_v5 }
  0x46   :  { %1664 = vmatpush3.bf16.msra.mxu1 %v1764_v5 }
  0x47   :  { %1665 = vmatprep.subr.bf16.mxu1 %v1765_v6 }
  0x4a   :  { %1666 = vmatpush3.bf16.msra.mxu1 %v1765_v6 }
  0x4b   :  { %1667 = vmatprep.subr.bf16.mxu1 %v1766_v7 }
  0x4e   :  { %1668 = vmatpush3.bf16.msra.mxu1 %v1766_v7 }
  0x4f   :  { %1669 = vmatprep.subr.bf16.mxu1 %v1767_v8 }
  0x52   :  { %1670 = vmatpush3.bf16.msra.mxu1 %v1767_v8 }
  0x55   :  { %1672 = vmatmul.mubr.bf16.vlgmr.msra.gmra.mxu1 %v1769_v9  ;;  %v1832_v9 = vld [vmem:[#allocation8 + $0x38] sm:$0xff]  }
  0x56   :  { %1675 = vmatprep.mubr.bf16.mxu1 %v1770_v10  ;;  %v1833_v10 = vld [vmem:[#allocation8 + $0x30] sm:$0xff]   ;;  %1703 = vmatprep.subr.bf16.mxu0 %v1832_v9 }
  0x57   :  { %1704 = vmatpush3.bf16.msra.mxu0 %v1832_v9 }
  0x58   :  { %1705 = vmatprep.subr.bf16.mxu0 %v1833_v10 }
  0x5b   :  { %1706 = vmatpush3.bf16.msra.mxu0 %v1833_v10 }
  0x5d   :  { %1676 = vmatmul.mubr.bf16.gmra.mxu1 %v1771_v11  ;;  %v2019_v11 = vld [vmem:[#allocation5] ss:$8 sps:$4 sm:$0xff]  }
  0x5e   :  { %1679 = vmatprep.mubr.bf16.mxu1 %v1772_v12  ;;  %v1834_v12 = vld [vmem:[#allocation8 + $0x28] sm:$0xff]  }
  0x5f   :  { %1707 = vmatprep.subr.bf16.mxu0 %v1834_v12 }
  0x60   :  { %1708 = vmatpush3.bf16.msra.mxu0 %v1834_v12 }
  0x65   :  { %1680 = vmatmul.mubr.bf16.gmra.mxu1 %v1773_v13  ;;  %v2024_v13 = vld [vmem:[#allocation5 + $0x14] ss:$8 sps:$4 sm:$0xff]  }
  0x66   :  { %1683 = vmatprep.mubr.bf16.mxu1 %v1774_v14  ;;  %v2028_v14 = vld [vmem:[#allocation5 + $0x10] ss:$8 sps:$4 sm:$0xff]  }
  0x6d   :  { %1684 = vmatmul.mubr.bf16.gmra.mxu1 %v1775_v15  ;;  %v2030_v15 = vld [vmem:[#allocation5 + $0x24] ss:$8 sps:$4 sm:$0xff]  }
  0x6e   :  { %1687 = vmatprep.mubr.bf16.mxu1 %v1776_v16  ;;  %v2034_v16 = vld [vmem:[#allocation5 + $0x20] ss:$8 sps:$4 sm:$0xff]  }
  0x75   :  { %1688 = vmatmul.mubr.bf16.gmra.mxu1 %v1777_v17  ;;  %v2036_v17 = vld [vmem:[#allocation5 + $0x34] ss:$8 sps:$4 sm:$0xff]  }
  0x76   :  { %1691 = vmatprep.mubr.bf16.mxu1 %v1778_v18  ;;  %v2040_v18 = vld [vmem:[#allocation5 + $0x30] ss:$8 sps:$4 sm:$0xff]  }
  0x7d   :  { %1692 = vmatmul.mubr.bf16.gmra.mxu1 %v1779_v19  ;;  %v2042_v19 = vld [vmem:[#allocation5 + $0x44] ss:$8 sps:$4 sm:$0xff]  }
  0x7e   :  { %1695 = vmatprep.mubr.bf16.mxu1 %v1780_v20  ;;  %v2046_v20 = vld [vmem:[#allocation5 + $0x40] ss:$8 sps:$4 sm:$0xff]  }
  0x85   :  { %1696 = vmatmul.mubr.bf16.gmra.mxu1 %v1781_v21  ;;  %v2048_v21 = vld [vmem:[#allocation5 + $0x54] ss:$8 sps:$4 sm:$0xff]  }
  0x86   :  { %1699 = vmatprep.mubr.bf16.mxu1 %v1782_v22  ;;  %v2052_v22 = vld [vmem:[#allocation5 + $0x50] ss:$8 sps:$4 sm:$0xff]  }
  0x8d   :  { %1700 = vmatmul.mubr.bf16.gmra.mxu1 %v1783_v23  ;;  %v2054_v23 = vld [vmem:[#allocation5 + $0x64] ss:$8 sps:$4 sm:$0xff]  }
  0x8e   :  { %680 = vmatprep.mubr.bf16.mxu1 %v2007_v24 }
 0x115   :  { %v2010_v25 = vpop.f32.mrf.mxu1 }
 0x117   :  { %v2012_v26 = vpop.f32.mrf.mxu1 }
 0x119   :  { %v1674_v27 = vpop.f32.mrf.mxu1 }
 0x11a   :  { %v466_v28 = vpack.c.bf16 %v1674_v27, %v2010_v25  ;;  %v2058_v25 = vld [vmem:[#allocation5 + $0x60] ss:$8 sps:$4 sm:$0xff]   ;;  %v2064_v27 = vld [vmem:[#allocation5 + $0x70] ss:$8 sps:$4 sm:$0xff]  }
 0x11b   :  { %v2015_v29 = vpop.f32.mrf.mxu1 }
 0x11c   :  { %v465_v30 = vpack.c.bf16 %v2015_v29, %v2012_v26  ;;  %v2060_v26 = vld [vmem:[#allocation5 + $0x74] ss:$8 sps:$4 sm:$0xff]   ;;  %v2070_v29 = vld [vmem:[#allocation5 + $0x80] ss:$8 sps:$4 sm:$0xff]  }
 0x11d   :  { %v1677_v31 = vpop.f32.mrf.mxu1 }
 0x11f   :  { %v322_v32 = vpop.f32.mrf.mxu1 }
 0x121   :  { %v1678_v33 = vpop.f32.mrf.mxu1 }
 0x122   :  { %v468_v34 = vpack.c.bf16 %v1678_v33, %v1677_v31  ;;  %v1835_v31 = vld [vmem:[#allocation8 + $0x20] sm:$0xff]  }
 0x123   :  { %v325_v35 = vpop.f32.mrf.mxu1  ;;  %1709 = vmatprep.subr.bf16.mxu0 %v1835_v31  ;;  %v2078_v33 = vld [vmem:[#allocation5 + $0xa4] ss:$8 sps:$4 sm:$0xff]  }
 0x124   :  { %v467_v36 = vpack.c.bf16 %v325_v35, %v322_v32  ;;  %v2076_v32 = vld [vmem:[#allocation5 + $0x90] ss:$8 sps:$4 sm:$0xff]   ;;  %1710 = vmatpush3.bf16.msra.mxu0 %v1835_v31 }
 0x125   :  { %v1681_v37 = vpop.f32.mrf.mxu1  ;;  %v1837_v35 = vld [vmem:[#allocation8 + $0x10] sm:$0xff]  }
 0x127   :  { %v338_v38 = vpop.f32.mrf.mxu1 }
 0x129   :  { %v1682_v39 = vpop.f32.mrf.mxu1 }
 0x12a   :  { %v470_v2 = vpack.c.bf16 %v1682_v39, %v1681_v37  ;;  %v2084_v37 = vld [vmem:[#allocation5 + $0xb4] ss:$8 sps:$4 sm:$0xff]   ;;  %v1839_v39 = vld [vmem:[#allocation8] sm:$0xff]  }
 0x12b   :  { %v341_v40 = vpop.f32.mrf.mxu1 }
 0x12c   :  { %v469_v4 = vpack.c.bf16 %v341_v40, %v338_v38  ;;  %v1838_v38 = vld [vmem:[#allocation8 + $0x8] sm:$0xff]   ;;  %v2088_v40 = vld [vmem:[#allocation5 + $0xb0] ss:$8 sps:$4 sm:$0xff]  }
 0x12d   :  { %v1685_v41 = vpop.f32.mrf.mxu1 }
 0x12f   :  { %v354_v42 = vpop.f32.mrf.mxu1 }
 0x131   :  { %v1686_v43 = vpop.f32.mrf.mxu1 }
 0x132   :  { %v472_v61 = vpack.c.bf16 %v1686_v43, %v1685_v41  ;;  %v2090_v41 = vld [vmem:[#allocation5 + $0xc4] ss:$8 sps:$4 sm:$0xff]   ;;  %v2096_v43 = vld [vmem:[#allocation5 + $0xd4] ss:$8 sps:$4 sm:$0xff]  }
 0x133   :  { %v357_v44 = vpop.f32.mrf.mxu1 }
 0x134   :  { %v471_v0 = vpack.c.bf16 %v357_v44, %v354_v42  ;;  %v2094_v42 = vld [vmem:[#allocation5 + $0xc0] ss:$8 sps:$4 sm:$0xff]   ;;  %v2100_v44 = vld [vmem:[#allocation5 + $0xd0] ss:$8 sps:$4 sm:$0xff]  }
 0x135   :  { %v1689_v45 = vpop.f32.mrf.mxu1  ;;  %2239 = vst [vmem:[#allocation15_spill] sm:$0xff] %v2100_v44 }
 0x137   :  { %v370_v46 = vpop.f32.mrf.mxu1 }
 0x139   :  { %v1690_v47 = vpop.f32.mrf.mxu1 }
 0x13a   :  { %v474_v7 = vpack.c.bf16 %v1690_v47, %v1689_v45  ;;  %v2102_v45 = vld [vmem:[#allocation5 + $0xe4] ss:$8 sps:$4 sm:$0xff]   ;;  %v2108_v47 = vld [vmem:[#allocation5 + $0xf4] ss:$8 sps:$4 sm:$0xff]  }
 0x13b   :  { %v373_v48 = vpop.f32.mrf.mxu1  ;;  %2240 = vst [vmem:[#allocation16_spill] sm:$0xff] %v2102_v45  ;;  %2242 = vst [vmem:[#allocation18_spill] sm:$0xff] %v2108_v47 }
 0x13c   :  { %v473_v8 = vpack.c.bf16 %v373_v48, %v370_v46  ;;  %v2106_v46 = vld [vmem:[#allocation5 + $0xe0] ss:$8 sps:$4 sm:$0xff]   ;;  %v2112_v48 = vld [vmem:[#allocation5 + $0xf0] ss:$8 sps:$4 sm:$0xff]  }
 0x13d   :  { %v1693_v49 = vpop.f32.mrf.mxu1  ;;  %2241 = vst [vmem:[#allocation17_spill] sm:$0xff] %v2106_v46  ;;  %2243 = vst [vmem:[#allocation19_spill] sm:$0xff] %v2112_v48 }
 0x13f   :  { %v386_v50 = vpop.f32.mrf.mxu1 }
 0x141   :  { %v1694_v51 = vpop.f32.mrf.mxu1 }
 0x142   :  { %v476_v5 = vpack.c.bf16 %v1694_v51, %v1693_v49 }
 0x143   :  { %v389_v52 = vpop.f32.mrf.mxu1 }
 0x144   :  { %v475_v6 = vpack.c.bf16 %v389_v52, %v386_v50 }
 0x145   :  { %v1697_v53 = vpop.f32.mrf.mxu1 }
 0x147   :  { %v402_v54 = vpop.f32.mrf.mxu1 }
 0x149   :  { %v1698_v55 = vpop.f32.mrf.mxu1 }
 0x14a   :  { %v478_v1 = vpack.c.bf16 %v1698_v55, %v1697_v53  ;;  %v2118_v53 = vld [vmem:[%s2230_s3] ss:$0 sm:$0xff] }
 0x14b   :  { %v405_v56 = vpop.f32.mrf.mxu1 }
 0x14c   :  { %v477_v3 = vpack.c.bf16 %v405_v56, %v402_v54 }
 0x14d   :  { %v1701_v57 = vpop.f32.mrf.mxu1 }
 0x14f   :  { %v418_v58 = vpop.f32.mrf.mxu1 }
 0x151   :  { %v1702_v59 = vpop.f32.mrf.mxu1 }
 0x152   :  { %v480_v60 = vpack.c.bf16 %v1702_v59, %v1701_v57 }
 0x153   :  { %v421_v62 = vpop.f32.mrf.mxu1 }
 0x154   :  { %v479_v63 = vpack.c.bf16 %v421_v62, %v418_v58  ;;  %1407 = vmatprep.subr.bf16.mxu1 %v480_v60 }
 0x155   :  { %1408 = vmatpush3.bf16.msra.mxu1 %v472_v61 }
 0x156   :  { %1409 = vmatprep.subr.bf16.mxu1 %v479_v63 }
 0x159   :  { %1410 = vmatpush3.bf16.msra.mxu1 %v471_v0 }
 0x15a   :  { %1411 = vmatprep.subr.bf16.mxu1 %v478_v1 }
 0x15d   :  { %1412 = vmatpush3.bf16.msra.mxu1 %v470_v2 }
 0x15e   :  { %1413 = vmatprep.subr.bf16.mxu1 %v477_v3 }
 0x161   :  { %1414 = vmatpush3.bf16.msra.mxu1 %v469_v4 }
 0x162   :  { %1415 = vmatprep.subr.bf16.mxu1 %v476_v5 }
 0x165   :  { %1416 = vmatpush3.bf16.msra.mxu1 %v468_v34  ;;  %v1836_v34 = vld [vmem:[#allocation8 + $0x18] sm:$0xff]  }
 0x166   :  { %1417 = vmatprep.subr.bf16.mxu1 %v475_v6  ;;  %1711 = vmatprep.subr.bf16.mxu0 %v1836_v34 }
 0x167   :  { %1712 = vmatpush3.bf16.msra.mxu0 %v1836_v34 }
 0x168   :  { %1713 = vmatprep.subr.bf16.mxu0 %v1837_v35 }
 0x169   :  { %1418 = vmatpush3.bf16.msra.mxu1 %v467_v36  ;;  %v2082_v36 = vld [vmem:[#allocation5 + $0xa0] ss:$8 sps:$4 sm:$0xff]  }
 0x16a   :  { %1419 = vmatprep.subr.bf16.mxu1 %v474_v7 }
 0x16b   :  { %1714 = vmatpush3.bf16.msra.mxu0 %v1837_v35 }
 0x16c   :  { %1715 = vmatprep.subr.bf16.mxu0 %v1838_v38 }
 0x16d   :  { %1420 = vmatpush3.bf16.msra.mxu1 %v466_v28  ;;  %v2066_v28 = vld [vmem:[#allocation5 + $0x84] ss:$8 sps:$4 sm:$0xff]  }
 0x16e   :  { %1421 = vmatprep.subr.bf16.mxu1 %v473_v8 }
 0x16f   :  { %1716 = vmatpush3.bf16.msra.mxu0 %v1838_v38 }
 0x170   :  { %1717 = vmatprep.subr.bf16.mxu0 %v1839_v39 }
 0x171   :  { %1422 = vmatpush3.bf16.msra.mxu1 %v465_v30  ;;  %v2072_v30 = vld [vmem:[#allocation5 + $0x94] ss:$8 sps:$4 sm:$0xff]  }
 0x173   :  { %1718 = vmatpush3.bf16.msra.mxu0 %v1839_v39 }
 0x174   :  { %681 = vmatmul.mubr.bf16.vlgmr.msra.gmra.mxu1 %v2019_v11 }
 0x175   :  { %688 = vmatprep.mubr.bf16.mxu1 %v2024_v13 }
 0x17c   :  { %689 = vmatmul.mubr.bf16.gmra.mxu1 %v2028_v14 }
 0x17d   :  { %696 = vmatprep.mubr.bf16.mxu1 %v2030_v15 }
 0x184   :  { %697 = vmatmul.mubr.bf16.gmra.mxu1 %v2034_v16 }
 0x185   :  { %704 = vmatprep.mubr.bf16.mxu1 %v2036_v17 }
 0x18c   :  { %705 = vmatmul.mubr.bf16.gmra.mxu1 %v2040_v18 }
 0x18d   :  { %712 = vmatprep.mubr.bf16.mxu1 %v2042_v19 }
 0x194   :  { %713 = vmatmul.mubr.bf16.gmra.mxu1 %v2046_v20 }
 0x195   :  { %720 = vmatprep.mubr.bf16.mxu1 %v2048_v21 }
 0x19c   :  { %721 = vmatmul.mubr.bf16.gmra.mxu1 %v2052_v22 }
 0x19d   :  { %728 = vmatprep.mubr.bf16.mxu1 %v2054_v23 }
 0x1a4   :  { %729 = vmatmul.mubr.bf16.gmra.mxu1 %v2058_v25 }
 0x1a5   :  { %736 = vmatprep.mubr.bf16.mxu1 %v2060_v26 }
 0x1ac   :  { %737 = vmatmul.mubr.bf16.gmra.mxu1 %v2064_v27 }
 0x1ad   :  { %744 = vmatprep.mubr.bf16.mxu1 %v2066_v28 }
 0x1b4   :  { %745 = vmatmul.mubr.bf16.gmra.mxu1 %v2070_v29 }
 0x1b5   :  { %752 = vmatprep.mubr.bf16.mxu1 %v2072_v30 }
 0x1bc   :  { %753 = vmatmul.mubr.bf16.gmra.mxu1 %v2076_v32 }
 0x1bd   :  { %760 = vmatprep.mubr.bf16.mxu1 %v2078_v33 }
 0x1c4   :  { %761 = vmatmul.mubr.bf16.gmra.mxu1 %v2082_v36 }
 0x1c5   :  { %768 = vmatprep.mubr.bf16.mxu1 %v2084_v37 }
 0x1cc   :  { %769 = vmatmul.mubr.bf16.gmra.mxu1 %v2088_v40 }
 0x1cd   :  { %776 = vmatprep.mubr.bf16.mxu1 %v2090_v41 }
 0x1d4   :  { %777 = vmatmul.mubr.bf16.gmra.mxu1 %v2094_v42 }
 0x1d5   :  { %784 = vmatprep.mubr.bf16.mxu1 %v2096_v43 }
 0x1dc   :  { %785 = vmatmul.mubr.bf16.gmra.mxu1 %v2100_v44 }
 0x1dd   :  { %792 = vmatprep.mubr.bf16.mxu1 %v2102_v45 }
 0x1e4   :  { %793 = vmatmul.mubr.bf16.gmra.mxu1 %v2106_v46 }
 0x1e5   :  { %800 = vmatprep.mubr.bf16.mxu1 %v2108_v47 }
 0x1ec   :  { %801 = vmatmul.mubr.bf16.gmra.mxu1 %v2112_v48 }
 0x234   :  { %v1423_v49 = vpop.f32.mrf.mxu1 }
 0x236   :  { %v1424_v50 = vpop.f32.mrf.mxu1 }
 0x237   :  { %v1425_v51 = vadd.f32 %v1424_v50, %v1423_v49 }
 0x238   :  { %v1426_v52 = vpop.f32.mrf.mxu1 }
 0x239   :  { %v683_v56 = vadd.f32 %v1425_v51, %v2118_v53 }
 0x23a   :  { %v1427_v54 = vpop.f32.mrf.mxu1 }
 0x23b   :  { %v1428_v55 = vadd.f32 %v1427_v54, %v1426_v52  ;;  %v809_v61 = vmax.f32 %v683_v56, 0.0 }
 0x23c   :  { %v1429_v57 = vpop.f32.mrf.mxu1 }
 0x23d   :  { %v686_v58 = vadd.f32 %v1428_v55, %v2118_v53 }
 0x23e   :  { %v1430_v59 = vpop.f32.mrf.mxu1 }
 0x23f   :  { %v1431_v60 = vadd.f32 %v1430_v59, %v1429_v57  ;;  %v810_v62 = vmax.f32 %v686_v58, 0.0 }
 0x240   :  { %v1432_v63 = vpop.f32.mrf.mxu1 }
 0x241   :  { %v841_v0 = vpack.c.bf16 %v810_v62, %v809_v61  ;;  %v691_v2 = vadd.f32 %v1431_v60, %v2118_v53 }
 0x242   :  { %v1433_v1 = vpop.f32.mrf.mxu1 }
 0x243   :  { %v1434_v3 = vadd.f32 %v1433_v1, %v1432_v63  ;;  %1719 = vmatprep.mubr.bf16.mxu0 %v841_v0  ;;  %v811_v7 = vmax.f32 %v691_v2, 0.0 }
 0x244   :  { %v1435_v4 = vpop.f32.mrf.mxu1 }
 0x245   :  { %v694_v5 = vadd.f32 %v1434_v3, %v2118_v53 }
 0x246   :  { %v1436_v6 = vpop.f32.mrf.mxu1 }
 0x247   :  { %v812_v8 = vmax.f32 %v694_v5, 0.0  ;;  %v1437_v9 = vadd.f32 %v1436_v6, %v1435_v4 }
 0x248   :  { %v1438_v10 = vpop.f32.mrf.mxu1 }
 0x249   :  { %v842_v12 = vpack.c.bf16 %v812_v8, %v811_v7  ;;  %v699_v34 = vadd.f32 %v1437_v9, %v2118_v53 }
 0x24a   :  { %v1439_v31 = vpop.f32.mrf.mxu1 }
 0x24b   :  { %v1440_v35 = vadd.f32 %v1439_v31, %v1438_v10  ;;  %1720 = vmatmul.mubr.bf16.vlgmr.msra.gmra.mxu0 %v842_v12  ;;  %v813_v50 = vmax.f32 %v699_v34, 0.0 }
 0x24c   :  { %v1441_v38 = vpop.f32.mrf.mxu1 }
 0x24d   :  { %v702_v39 = vadd.f32 %v1440_v35, %v2118_v53 }
 0x24e   :  { %v1442_v49 = vpop.f32.mrf.mxu1 }
 0x24f   :  { %v814_v51 = vmax.f32 %v702_v39, 0.0  ;;  %v1443_v52 = vadd.f32 %v1442_v49, %v1441_v38 }
 0x250   :  { %v1444_v54 = vpop.f32.mrf.mxu1 }
 0x251   :  { %v843_v55 = vpack.c.bf16 %v814_v51, %v813_v50  ;;  %v707_v57 = vadd.f32 %v1443_v52, %v2118_v53 }
 0x252   :  { %v1445_v56 = vpop.f32.mrf.mxu1 }
 0x253   :  { %v1446_v58 = vadd.f32 %v1445_v56, %v1444_v54  ;;  %1723 = vmatprep.mubr.bf16.mxu0 %v843_v55  ;;  %v815_v62 = vmax.f32 %v707_v57, 0.0 }
 0x254   :  { %v1447_v59 = vpop.f32.mrf.mxu1 }
 0x255   :  { %v710_v60 = vadd.f32 %v1446_v58, %v2118_v53 }
 0x256   :  { %v1448_v61 = vpop.f32.mrf.mxu1 }
 0x257   :  { %v816_v63 = vmax.f32 %v710_v60, 0.0  ;;  %v1449_v0 = vadd.f32 %v1448_v61, %v1447_v59 }
 0x258   :  { %v1450_v1 = vpop.f32.mrf.mxu1 }
 0x259   :  { %v844_v2 = vpack.c.bf16 %v816_v63, %v815_v62  ;;  %v715_v4 = vadd.f32 %v1449_v0, %v2118_v53 }
 0x25a   :  { %v1451_v3 = vpop.f32.mrf.mxu1 }
 0x25b   :  { %v1452_v5 = vadd.f32 %v1451_v3, %v1450_v1  ;;  %1724 = vmatmul.mubr.bf16.gmra.mxu0 %v844_v2  ;;  %v817_v9 = vmax.f32 %v715_v4, 0.0 }
 0x25c   :  { %v1453_v6 = vpop.f32.mrf.mxu1 }
 0x25d   :  { %v718_v7 = vadd.f32 %v1452_v5, %v2118_v53 }
 0x25e   :  { %v1454_v8 = vpop.f32.mrf.mxu1 }
 0x25f   :  { %v818_v10 = vmax.f32 %v718_v7, 0.0  ;;  %v1455_v12 = vadd.f32 %v1454_v8, %v1453_v6 }
 0x260   :  { %v1456_v31 = vpop.f32.mrf.mxu1 }
 0x261   :  { %v845_v34 = vpack.c.bf16 %v818_v10, %v817_v9  ;;  %v723_v38 = vadd.f32 %v1455_v12, %v2118_v53 }
 0x262   :  { %v1457_v35 = vpop.f32.mrf.mxu1 }
 0x263   :  { %v1458_v39 = vadd.f32 %v1457_v35, %v1456_v31  ;;  %1727 = vmatprep.mubr.bf16.mxu0 %v845_v34  ;;  %v819_v52 = vmax.f32 %v723_v38, 0.0 }
 0x264   :  { %v1459_v49 = vpop.f32.mrf.mxu1 }
 0x265   :  { %v726_v50 = vadd.f32 %v1458_v39, %v2118_v53 }
 0x266   :  { %v1460_v51 = vpop.f32.mrf.mxu1 }
 0x267   :  { %v820_v54 = vmax.f32 %v726_v50, 0.0  ;;  %v1461_v55 = vadd.f32 %v1460_v51, %v1459_v49 }
 0x268   :  { %v1462_v56 = vpop.f32.mrf.mxu1 }
 0x269   :  { %v846_v57 = vpack.c.bf16 %v820_v54, %v819_v52  ;;  %v731_v59 = vadd.f32 %v1461_v55, %v2118_v53 }
 0x26a   :  { %v1463_v58 = vpop.f32.mrf.mxu1 }
 0x26b   :  { %v1464_v60 = vadd.f32 %v1463_v58, %v1462_v56  ;;  %1728 = vmatmul.mubr.bf16.gmra.mxu0 %v846_v57  ;;  %v821_v0 = vmax.f32 %v731_v59, 0.0 }
 0x26c   :  { %v1465_v61 = vpop.f32.mrf.mxu1 }
 0x26d   :  { %v734_v62 = vadd.f32 %v1464_v60, %v2118_v53 }
 0x26e   :  { %v1466_v63 = vpop.f32.mrf.mxu1 }
 0x26f   :  { %v822_v1 = vmax.f32 %v734_v62, 0.0  ;;  %v1467_v2 = vadd.f32 %v1466_v63, %v1465_v61 }
 0x270   :  { %v1468_v3 = vpop.f32.mrf.mxu1 }
 0x271   :  { %v847_v4 = vpack.c.bf16 %v822_v1, %v821_v0  ;;  %v739_v6 = vadd.f32 %v1467_v2, %v2118_v53 }
 0x272   :  { %v1469_v5 = vpop.f32.mrf.mxu1 }
 0x273   :  { %v1470_v7 = vadd.f32 %v1469_v5, %v1468_v3  ;;  %1731 = vmatprep.mubr.bf16.mxu0 %v847_v4  ;;  %v823_v12 = vmax.f32 %v739_v6, 0.0 }
 0x274   :  { %v1471_v8 = vpop.f32.mrf.mxu1 }
 0x275   :  { %v742_v9 = vadd.f32 %v1470_v7, %v2118_v53 }
 0x276   :  { %v1472_v10 = vpop.f32.mrf.mxu1 }
 0x277   :  { %v824_v31 = vmax.f32 %v742_v9, 0.0  ;;  %v1473_v34 = vadd.f32 %v1472_v10, %v1471_v8 }
 0x278   :  { %v1474_v35 = vpop.f32.mrf.mxu1 }
 0x279   :  { %v848_v38 = vpack.c.bf16 %v824_v31, %v823_v12  ;;  %v747_v49 = vadd.f32 %v1473_v34, %v2118_v53 }
 0x27a   :  { %v1475_v39 = vpop.f32.mrf.mxu1 }
 0x27b   :  { %v1476_v50 = vadd.f32 %v1475_v39, %v1474_v35  ;;  %1732 = vmatmul.mubr.bf16.gmra.mxu0 %v848_v38  ;;  %v825_v55 = vmax.f32 %v747_v49, 0.0 }
 0x27c   :  { %v1477_v51 = vpop.f32.mrf.mxu1 }
 0x27d   :  { %v750_v52 = vadd.f32 %v1476_v50, %v2118_v53 }
 0x27e   :  { %v1478_v54 = vpop.f32.mrf.mxu1 }
 0x27f   :  { %v826_v56 = vmax.f32 %v750_v52, 0.0  ;;  %v1479_v57 = vadd.f32 %v1478_v54, %v1477_v51 }
 0x280   :  { %v1480_v58 = vpop.f32.mrf.mxu1 }
 0x281   :  { %v849_v59 = vpack.c.bf16 %v826_v56, %v825_v55  ;;  %v755_v61 = vadd.f32 %v1479_v57, %v2118_v53 }
 0x282   :  { %v1481_v60 = vpop.f32.mrf.mxu1 }
 0x283   :  { %v1482_v62 = vadd.f32 %v1481_v60, %v1480_v58  ;;  %1735 = vmatprep.mubr.bf16.mxu0 %v849_v59  ;;  %v827_v2 = vmax.f32 %v755_v61, 0.0 }
 0x284   :  { %v1483_v63 = vpop.f32.mrf.mxu1 }
 0x285   :  { %v758_v0 = vadd.f32 %v1482_v62, %v2118_v53 }
 0x286   :  { %v1484_v1 = vpop.f32.mrf.mxu1 }
 0x287   :  { %v828_v3 = vmax.f32 %v758_v0, 0.0  ;;  %v1485_v4 = vadd.f32 %v1484_v1, %v1483_v63 }
 0x288   :  { %v1486_v5 = vpop.f32.mrf.mxu1 }
 0x289   :  { %v850_v6 = vpack.c.bf16 %v828_v3, %v827_v2  ;;  %v763_v8 = vadd.f32 %v1485_v4, %v2118_v53 }
 0x28a   :  { %v1487_v7 = vpop.f32.mrf.mxu1 }
 0x28b   :  { %v1488_v9 = vadd.f32 %v1487_v7, %v1486_v5  ;;  %1736 = vmatmul.mubr.bf16.gmra.mxu0 %v850_v6  ;;  %v829_v34 = vmax.f32 %v763_v8, 0.0 }
 0x28c   :  { %v1489_v10 = vpop.f32.mrf.mxu1 }
 0x28d   :  { %v766_v12 = vadd.f32 %v1488_v9, %v2118_v53 }
 0x28e   :  { %v1490_v31 = vpop.f32.mrf.mxu1 }
 0x28f   :  { %v830_v35 = vmax.f32 %v766_v12, 0.0  ;;  %v1491_v38 = vadd.f32 %v1490_v31, %v1489_v10 }
 0x290   :  { %v1492_v39 = vpop.f32.mrf.mxu1 }
 0x291   :  { %v851_v49 = vpack.c.bf16 %v830_v35, %v829_v34  ;;  %v771_v51 = vadd.f32 %v1491_v38, %v2118_v53 }
 0x292   :  { %v1493_v50 = vpop.f32.mrf.mxu1 }
 0x293   :  { %v1494_v52 = vadd.f32 %v1493_v50, %v1492_v39  ;;  %1739 = vmatprep.mubr.bf16.mxu0 %v851_v49  ;;  %v831_v57 = vmax.f32 %v771_v51, 0.0 }
 0x294   :  { %v1495_v54 = vpop.f32.mrf.mxu1 }
 0x295   :  { %v774_v55 = vadd.f32 %v1494_v52, %v2118_v53 }
 0x296   :  { %v1496_v56 = vpop.f32.mrf.mxu1 }
 0x297   :  { %v832_v58 = vmax.f32 %v774_v55, 0.0  ;;  %v1497_v59 = vadd.f32 %v1496_v56, %v1495_v54 }
 0x298   :  { %v1498_v60 = vpop.f32.mrf.mxu1 }
 0x299   :  { %v852_v61 = vpack.c.bf16 %v832_v58, %v831_v57  ;;  %v779_v63 = vadd.f32 %v1497_v59, %v2118_v53 }
 0x29a   :  { %v1499_v62 = vpop.f32.mrf.mxu1 }
 0x29b   :  { %v1500_v0 = vadd.f32 %v1499_v62, %v1498_v60  ;;  %1740 = vmatmul.mubr.bf16.gmra.mxu0 %v852_v61  ;;  %v833_v4 = vmax.f32 %v779_v63, 0.0 }
 0x29c   :  { %v1501_v1 = vpop.f32.mrf.mxu1 }
 0x29d   :  { %v782_v2 = vadd.f32 %v1500_v0, %v2118_v53 }
 0x29e   :  { %v1502_v3 = vpop.f32.mrf.mxu1 }
 0x29f   :  { %v834_v5 = vmax.f32 %v782_v2, 0.0  ;;  %v1503_v6 = vadd.f32 %v1502_v3, %v1501_v1 }
 0x2a0   :  { %v1504_v7 = vpop.f32.mrf.mxu1 }
 0x2a1   :  { %v853_v8 = vpack.c.bf16 %v834_v5, %v833_v4  ;;  %v787_v10 = vadd.f32 %v1503_v6, %v2118_v53 }
 0x2a2   :  { %v1505_v9 = vpop.f32.mrf.mxu1 }
 0x2a3   :  { %v1506_v12 = vadd.f32 %v1505_v9, %v1504_v7  ;;  %1743 = vmatprep.mubr.bf16.mxu0 %v853_v8  ;;  %v835_v38 = vmax.f32 %v787_v10, 0.0 }
 0x2a4   :  { %v1507_v31 = vpop.f32.mrf.mxu1 }
 0x2a5   :  { %v790_v34 = vadd.f32 %v1506_v12, %v2118_v53 }
 0x2a6   :  { %v1508_v35 = vpop.f32.mrf.mxu1 }
 0x2a7   :  { %v836_v39 = vmax.f32 %v790_v34, 0.0  ;;  %v1509_v49 = vadd.f32 %v1508_v35, %v1507_v31 }
 0x2a8   :  { %v1510_v50 = vpop.f32.mrf.mxu1 }
 0x2a9   :  { %v854_v51 = vpack.c.bf16 %v836_v39, %v835_v38  ;;  %v795_v54 = vadd.f32 %v1509_v49, %v2118_v53 }
 0x2aa   :  { %v1511_v52 = vpop.f32.mrf.mxu1 }
 0x2ab   :  { %v1512_v55 = vadd.f32 %v1511_v52, %v1510_v50  ;;  %1744 = vmatmul.mubr.bf16.gmra.mxu0 %v854_v51  ;;  %v837_v59 = vmax.f32 %v795_v54, 0.0 }
 0x2ac   :  { %v1513_v56 = vpop.f32.mrf.mxu1 }
 0x2ad   :  { %v798_v57 = vadd.f32 %v1512_v55, %v2118_v53 }
 0x2ae   :  { %v1514_v58 = vpop.f32.mrf.mxu1 }
 0x2af   :  { %v838_v60 = vmax.f32 %v798_v57, 0.0  ;;  %v1515_v61 = vadd.f32 %v1514_v58, %v1513_v56 }
 0x2b0   :  { %v1516_v62 = vpop.f32.mrf.mxu1 }
 0x2b1   :  { %v855_v63 = vpack.c.bf16 %v838_v60, %v837_v59  ;;  %v803_v1 = vadd.f32 %v1515_v61, %v2118_v53 }
 0x2b2   :  { %v1517_v0 = vpop.f32.mrf.mxu1 }
 0x2b3   :  { %v1518_v2 = vadd.f32 %v1517_v0, %v1516_v62  ;;  %1747 = vmatprep.mubr.bf16.mxu0 %v855_v63  ;;  %v839_v4 = vmax.f32 %v803_v1, 0.0 }
 0x2b5   :  { %v806_v3 = vadd.f32 %v1518_v2, %v2118_v53 }
 0x2b7   :  { %v840_v5 = vmax.f32 %v806_v3, 0.0 }
 0x2b9   :  { %v856_v6 = vpack.c.bf16 %v840_v5, %v839_v4 }
 0x2bb   :  { %1748 = vmatmul.mubr.bf16.gmra.mxu0 %v856_v6 }
 0x2bc   :  { %1137 = vmatprep.mubr.bf16.mxu0 %v2007_v24 }
 0x30b   :  { %v1721_v7 = vpop.f32.mrf.mxu0 }
 0x30d   :  { %v955_v8 = vpop.f32.mrf.mxu0 }
 0x30f   :  { %v1722_v9 = vpop.f32.mrf.mxu0 }
 0x310   :  { %v1083_v10 = vpack.c.bf16 %v1722_v9, %v1721_v7 }
 0x311   :  { %v958_v12 = vpop.f32.mrf.mxu0 }
 0x312   :  { %v1082_v31 = vpack.c.bf16 %v958_v12, %v955_v8 }
 0x31b   :  { %v1725_v34 = vpop.f32.mrf.mxu0 }
 0x31d   :  { %v971_v35 = vpop.f32.mrf.mxu0 }
 0x31f   :  { %v1726_v38 = vpop.f32.mrf.mxu0 }
 0x320   :  { %v1085_v39 = vpack.c.bf16 %v1726_v38, %v1725_v34 }
 0x321   :  { %v974_v49 = vpop.f32.mrf.mxu0 }
 0x322   :  { %v1084_v50 = vpack.c.bf16 %v974_v49, %v971_v35 }
 0x32b   :  { %v1729_v51 = vpop.f32.mrf.mxu0 }
 0x32d   :  { %v987_v53 = vpop.f32.mrf.mxu0 }
 0x32f   :  { %v1730_v52 = vpop.f32.mrf.mxu0 }
 0x330   :  { %v1087_v48 = vpack.c.bf16 %v1730_v52, %v1729_v51 }
 0x331   :  { %v990_v54 = vpop.f32.mrf.mxu0 }
 0x332   :  { %v1086_v46 = vpack.c.bf16 %v990_v54, %v987_v53 }
 0x33b   :  { %v1733_v55 = vpop.f32.mrf.mxu0 }
 0x33d   :  { %v1003_v56 = vpop.f32.mrf.mxu0 }
 0x33f   :  { %v1734_v57 = vpop.f32.mrf.mxu0 }
 0x340   :  { %v1089_v12 = vpack.c.bf16 %v1734_v57, %v1733_v55 }
 0x341   :  { %v1006_v24 = vpop.f32.mrf.mxu0 }
 0x342   :  { %v1088_v38 = vpack.c.bf16 %v1006_v24, %v1003_v56 }
 0x34b   :  { %v1737_v58 = vpop.f32.mrf.mxu0 }
 0x34d   :  { %v1019_v59 = vpop.f32.mrf.mxu0 }
 0x34f   :  { %v1738_v60 = vpop.f32.mrf.mxu0 }
 0x350   :  { %v1091_v55 = vpack.c.bf16 %v1738_v60, %v1737_v58 }
 0x351   :  { %v1022_v61 = vpop.f32.mrf.mxu0 }
 0x352   :  { %v1090_v57 = vpack.c.bf16 %v1022_v61, %v1019_v59 }
 0x35b   :  { %v1741_v62 = vpop.f32.mrf.mxu0 }
 0x35d   :  { %v1035_v63 = vpop.f32.mrf.mxu0 }
 0x35f   :  { %v1742_v0 = vpop.f32.mrf.mxu0 }
 0x360   :  { %v1093_v45 = vpack.c.bf16 %v1742_v0, %v1741_v62 }
 0x361   :  { %v1038_v1 = vpop.f32.mrf.mxu0 }
 0x362   :  { %v1092_v44 = vpack.c.bf16 %v1038_v1, %v1035_v63 }
 0x36b   :  { %v1745_v2 = vpop.f32.mrf.mxu0 }
 0x36d   :  { %v1051_v3 = vpop.f32.mrf.mxu0 }
 0x36f   :  { %v1746_v4 = vpop.f32.mrf.mxu0 }
 0x370   :  { %v1095_v49 = vpack.c.bf16 %v1746_v4, %v1745_v2 }
 0x371   :  { %v1054_v5 = vpop.f32.mrf.mxu0 }
 0x372   :  { %v1094_v47 = vpack.c.bf16 %v1054_v5, %v1051_v3 }
 0x37b   :  { %v1749_v6 = vpop.f32.mrf.mxu0 }
 0x37d   :  { %v1067_v7 = vpop.f32.mrf.mxu0 }
 0x37f   :  { %v1750_v8 = vpop.f32.mrf.mxu0 }
 0x380   :  { %v1097_v9 = vpack.c.bf16 %v1750_v8, %v1749_v6 }
 0x381   :  { %v1070_v34 = vpop.f32.mrf.mxu0 }
 0x382   :  { %v1096_v35 = vpack.c.bf16 %v1070_v34, %v1067_v7  ;;  %1543 = vmatprep.subr.bf16.mxu0 %v1097_v9 }
 0x383   :  { %1544 = vmatpush3.bf16.msra.mxu0 %v1089_v12 }
 0x384   :  { %1545 = vmatprep.subr.bf16.mxu0 %v1096_v35 }
 0x387   :  { %1546 = vmatpush3.bf16.msra.mxu0 %v1088_v38 }
 0x388   :  { %1547 = vmatprep.subr.bf16.mxu0 %v1095_v49 }
 0x38b   :  { %1548 = vmatpush3.bf16.msra.mxu0 %v1087_v48 }
 0x38c   :  { %1549 = vmatprep.subr.bf16.mxu0 %v1094_v47 }
 0x38f   :  { %1550 = vmatpush3.bf16.msra.mxu0 %v1086_v46 }
 0x390   :  { %1551 = vmatprep.subr.bf16.mxu0 %v1093_v45 }
 0x393   :  { %1552 = vmatpush3.bf16.msra.mxu0 %v1085_v39 }
 0x394   :  { %1553 = vmatprep.subr.bf16.mxu0 %v1092_v44 }
 0x397   :  { %1554 = vmatpush3.bf16.msra.mxu0 %v1084_v50 }
 0x398   :  { %1555 = vmatprep.subr.bf16.mxu0 %v1091_v55 }
 0x39b   :  { %1556 = vmatpush3.bf16.msra.mxu0 %v1083_v10 }
 0x39c   :  { %1557 = vmatprep.subr.bf16.mxu0 %v1090_v57 }
 0x39f   :  { %1558 = vmatpush3.bf16.msra.mxu0 %v1082_v31 }
 0x3a2   :  { %1138 = vmatmul.mubr.bf16.vlgmr.msra.gmra.mxu0 %v2019_v11  ;;  %v2244_v11 = vld [vmem:[#allocation15_spill] sm:$0xff] }
 0x3a3   :  { %1145 = vmatprep.mubr.bf16.mxu0 %v2024_v13  ;;  %v2245_v13 = vld [vmem:[#allocation16_spill] sm:$0xff] }
 0x3aa   :  { %1146 = vmatmul.mubr.bf16.gmra.mxu0 %v2028_v14  ;;  %v2246_v14 = vld [vmem:[#allocation17_spill] sm:$0xff] }
 0x3ab   :  { %1153 = vmatprep.mubr.bf16.mxu0 %v2030_v15  ;;  %v2247_v15 = vld [vmem:[#allocation18_spill] sm:$0xff] }
 0x3b2   :  { %1154 = vmatmul.mubr.bf16.gmra.mxu0 %v2034_v16  ;;  %v2248_v16 = vld [vmem:[#allocation19_spill] sm:$0xff] }
 0x3b3   :  { %1161 = vmatprep.mubr.bf16.mxu0 %v2036_v17 }
 0x3ba   :  { %1162 = vmatmul.mubr.bf16.gmra.mxu0 %v2040_v18  ;;  %v2187_v18 = vld [vmem:[%s2232_s5] ss:$0 sm:$0xff]  ;;  %s1956_s5 = smov [#allocation10]  }
 0x3bb   :  { %1169 = vmatprep.mubr.bf16.mxu0 %v2042_v19  ;;  %s1303_s20 = sshll.u32 %s1956_s5, 4  ;;  %s1304_s20 = int_to_ptr.vmem [resolvable:$true] %s1303_s20 }
 0x3bc   :  { %s1920_s21 = scalar_lea.vmem %s1304_s20, 4096  ;;  %p1925_p7 = scmp.lt.s32.totalorder %s1304_s20, %s1304_s20 }
 0x3bd   :  { %p1921_p6 = scmp.ne.s32.totalorder %s1304_s20, %s1920_s21  ;;  %p1926_p8 = scmp.lt.s32.totalorder %s1920_s21, %s1920_s21 }
 0x3bf   :  { %p1927_p9 = por %p1926_p8, %p1925_p7 }
 0x3c1   :  { %p1928_p10 = pnand %p1927_p9, %p1921_p6 }
 0x3c2   :  { %1170 = vmatmul.mubr.bf16.gmra.mxu0 %v2046_v20 }
 0x3c3   :  { %1177 = vmatprep.mubr.bf16.mxu0 %v2048_v21 }
 0x3ca   :  { %1178 = vmatmul.mubr.bf16.gmra.mxu0 %v2052_v22 }
 0x3cb   :  { %1185 = vmatprep.mubr.bf16.mxu0 %v2054_v23 }
 0x3d2   :  { %1186 = vmatmul.mubr.bf16.gmra.mxu0 %v2058_v25 }
 0x3d3   :  { %1193 = vmatprep.mubr.bf16.mxu0 %v2060_v26 }
 0x3da   :  { %1194 = vmatmul.mubr.bf16.gmra.mxu0 %v2064_v27 }
 0x3db   :  { %1201 = vmatprep.mubr.bf16.mxu0 %v2066_v28 }
 0x3e2   :  { %1202 = vmatmul.mubr.bf16.gmra.mxu0 %v2070_v29 }
 0x3e3   :  { %1209 = vmatprep.mubr.bf16.mxu0 %v2072_v30 }
 0x3ea   :  { %1210 = vmatmul.mubr.bf16.gmra.mxu0 %v2076_v32 }
 0x3eb   :  { %1217 = vmatprep.mubr.bf16.mxu0 %v2078_v33 }
 0x3f2   :  { %1218 = vmatmul.mubr.bf16.gmra.mxu0 %v2082_v36 }
 0x3f3   :  { %1225 = vmatprep.mubr.bf16.mxu0 %v2084_v37 }
 0x3fa   :  { %1226 = vmatmul.mubr.bf16.gmra.mxu0 %v2088_v40 }
 0x3fb   :  { %1233 = vmatprep.mubr.bf16.mxu0 %v2090_v41 }
 0x402   :  { %1234 = vmatmul.mubr.bf16.gmra.mxu0 %v2094_v42 }
 0x403   :  { %1241 = vmatprep.mubr.bf16.mxu0 %v2096_v43 }
 0x40a   :  { %1242 = vmatmul.mubr.bf16.gmra.mxu0 %v2244_v11 }
 0x40b   :  { %1249 = vmatprep.mubr.bf16.mxu0 %v2245_v13 }
 0x412   :  { %1250 = vmatmul.mubr.bf16.gmra.mxu0 %v2246_v14 }
 0x413   :  { %1257 = vmatprep.mubr.bf16.mxu0 %v2247_v15 }
 0x41a   :  { %1258 = vmatmul.mubr.bf16.gmra.mxu0 %v2248_v16 }
 0x462   :  { %v1559_v17 = vpop.f32.mrf.mxu0 }
 0x464   :  { %v1560_v19 = vpop.f32.mrf.mxu0 }
 0x465   :  { %v1561_v20 = vadd.f32 %v1560_v19, %v1559_v17 }
 0x466   :  { %v1562_v21 = vpop.f32.mrf.mxu0 }
 0x467   :  { %v1140_v22 = vadd.f32 %v1561_v20, %v2187_v18 }
 0x468   :  { %v1563_v23 = vpop.f32.mrf.mxu0 }
 0x469   :  { %1266 = vst [vmem:[#allocation10] sm:$0xff] %v1140_v22  ;;  %v1564_v25 = vadd.f32 %v1563_v23, %v1562_v21 }
 0x46a   :  { %v1565_v26 = vpop.f32.mrf.mxu0 }
 0x46b   :  { %v1143_v27 = vadd.f32 %v1564_v25, %v2187_v18 }
 0x46c   :  { %v1566_v28 = vpop.f32.mrf.mxu0 }
 0x46d   :  { %1267 = vst [vmem:[#allocation10 + $0x8] sm:$0xff] %v1143_v27  ;;  %v1567_v29 = vadd.f32 %v1566_v28, %v1565_v26 }
 0x46e   :  { %v1568_v30 = vpop.f32.mrf.mxu0 }
 0x46f   :  { %v1148_v32 = vadd.f32 %v1567_v29, %v2187_v18 }
 0x470   :  { %v1569_v33 = vpop.f32.mrf.mxu0 }
 0x471   :  { %1268 = vst [vmem:[#allocation10 + $0x10] sm:$0xff] %v1148_v32  ;;  %v1570_v36 = vadd.f32 %v1569_v33, %v1568_v30 }
 0x472   :  { %v1571_v37 = vpop.f32.mrf.mxu0 }
 0x473   :  { %v1151_v40 = vadd.f32 %v1570_v36, %v2187_v18 }
 0x474   :  { %v1572_v41 = vpop.f32.mrf.mxu0 }
 0x475   :  { %1269 = vst [vmem:[#allocation10 + $0x18] sm:$0xff] %v1151_v40  ;;  %v1573_v42 = vadd.f32 %v1572_v41, %v1571_v37 }
 0x476   :  { %v1574_v43 = vpop.f32.mrf.mxu0 }
 0x477   :  { %v1156_v44 = vadd.f32 %v1573_v42, %v2187_v18 }
 0x478   :  { %v1575_v45 = vpop.f32.mrf.mxu0 }
 0x479   :  { %1270 = vst [vmem:[#allocation10 + $0x20] sm:$0xff] %v1156_v44  ;;  %v1576_v46 = vadd.f32 %v1575_v45, %v1574_v43 }
 0x47a   :  { %v1577_v47 = vpop.f32.mrf.mxu0 }
 0x47b   :  { %v1159_v48 = vadd.f32 %v1576_v46, %v2187_v18 }
 0x47c   :  { %v1578_v10 = vpop.f32.mrf.mxu0 }
 0x47d   :  { %1271 = vst [vmem:[#allocation10 + $0x28] sm:$0xff] %v1159_v48  ;;  %v1579_v31 = vadd.f32 %v1578_v10, %v1577_v47 }
 0x47e   :  { %v1580_v39 = vpop.f32.mrf.mxu0 }
 0x47f   :  { %v1164_v50 = vadd.f32 %v1579_v31, %v2187_v18 }
 0x480   :  { %v1581_v51 = vpop.f32.mrf.mxu0 }
 0x481   :  { %1272 = vst [vmem:[#allocation10 + $0x30] sm:$0xff] %v1164_v50  ;;  %v1582_v53 = vadd.f32 %v1581_v51, %v1580_v39 }
 0x482   :  { %v1583_v52 = vpop.f32.mrf.mxu0 }
 0x483   :  { %v1167_v54 = vadd.f32 %v1582_v53, %v2187_v18 }
 0x484   :  { %v1584_v56 = vpop.f32.mrf.mxu0 }
 0x485   :  { %1273 = vst [vmem:[#allocation10 + $0x38] sm:$0xff] %v1167_v54  ;;  %v1585_v24 = vadd.f32 %v1584_v56, %v1583_v52 }
 0x486   :  { %v1586_v58 = vpop.f32.mrf.mxu0 }
 0x487   :  { %v1172_v59 = vadd.f32 %v1585_v24, %v2187_v18 }
 0x488   :  { %v1587_v60 = vpop.f32.mrf.mxu0 }
 0x489   :  { %1274 = vst [vmem:[#allocation10 + $0x40] sm:$0xff] %v1172_v59  ;;  %v1588_v61 = vadd.f32 %v1587_v60, %v1586_v58 }
 0x48a   :  { %v1589_v62 = vpop.f32.mrf.mxu0 }
 0x48b   :  { %v1175_v63 = vadd.f32 %v1588_v61, %v2187_v18 }
 0x48c   :  { %v1590_v0 = vpop.f32.mrf.mxu0 }
 0x48d   :  { %1275 = vst [vmem:[#allocation10 + $0x48] sm:$0xff] %v1175_v63  ;;  %v1591_v1 = vadd.f32 %v1590_v0, %v1589_v62 }
 0x48e   :  { %v1592_v2 = vpop.f32.mrf.mxu0 }
 0x48f   :  { %v1180_v3 = vadd.f32 %v1591_v1, %v2187_v18 }
 0x490   :  { %v1593_v4 = vpop.f32.mrf.mxu0 }
 0x491   :  { %1276 = vst [vmem:[#allocation10 + $0x50] sm:$0xff] %v1180_v3  ;;  %v1594_v5 = vadd.f32 %v1593_v4, %v1592_v2 }
 0x492   :  { %v1595_v6 = vpop.f32.mrf.mxu0 }
 0x493   :  { %v1183_v7 = vadd.f32 %v1594_v5, %v2187_v18 }
 0x494   :  { %v1596_v8 = vpop.f32.mrf.mxu0 }
 0x495   :  { %1277 = vst [vmem:[#allocation10 + $0x58] sm:$0xff] %v1183_v7  ;;  %v1597_v9 = vadd.f32 %v1596_v8, %v1595_v6 }
 0x496   :  { %v1598_v12 = vpop.f32.mrf.mxu0 }
 0x497   :  { %v1188_v34 = vadd.f32 %v1597_v9, %v2187_v18 }
 0x498   :  { %v1599_v35 = vpop.f32.mrf.mxu0 }
 0x499   :  { %1278 = vst [vmem:[#allocation10 + $0x60] sm:$0xff] %v1188_v34  ;;  %v1600_v38 = vadd.f32 %v1599_v35, %v1598_v12 }
 0x49a   :  { %v1601_v49 = vpop.f32.mrf.mxu0 }
 0x49b   :  { %v1191_v55 = vadd.f32 %v1600_v38, %v2187_v18 }
 0x49c   :  { %v1602_v57 = vpop.f32.mrf.mxu0 }
 0x49d   :  { %1279 = vst [vmem:[#allocation10 + $0x68] sm:$0xff] %v1191_v55  ;;  %v1603_v11 = vadd.f32 %v1602_v57, %v1601_v49 }
 0x49e   :  { %v1604_v13 = vpop.f32.mrf.mxu0 }
 0x49f   :  { %v1196_v14 = vadd.f32 %v1603_v11, %v2187_v18 }
 0x4a0   :  { %v1605_v15 = vpop.f32.mrf.mxu0 }
 0x4a1   :  { %1280 = vst [vmem:[#allocation10 + $0x70] sm:$0xff] %v1196_v14  ;;  %v1606_v16 = vadd.f32 %v1605_v15, %v1604_v13 }
 0x4a2   :  { %v1607_v17 = vpop.f32.mrf.mxu0 }
 0x4a3   :  { %v1199_v19 = vadd.f32 %v1606_v16, %v2187_v18 }
 0x4a4   :  { %v1608_v20 = vpop.f32.mrf.mxu0 }
 0x4a5   :  { %1281 = vst [vmem:[#allocation10 + $0x78] sm:$0xff] %v1199_v19  ;;  %v1609_v21 = vadd.f32 %v1608_v20, %v1607_v17 }
 0x4a6   :  { %v1610_v22 = vpop.f32.mrf.mxu0 }
 0x4a7   :  { %v1204_v23 = vadd.f32 %v1609_v21, %v2187_v18 }
 0x4a8   :  { %v1611_v25 = vpop.f32.mrf.mxu0 }
 0x4a9   :  { %1282 = vst [vmem:[#allocation10 + $0x80] sm:$0xff] %v1204_v23  ;;  %v1612_v26 = vadd.f32 %v1611_v25, %v1610_v22 }
 0x4aa   :  { %v1613_v27 = vpop.f32.mrf.mxu0 }
 0x4ab   :  { %v1207_v28 = vadd.f32 %v1612_v26, %v2187_v18 }
 0x4ac   :  { %v1614_v29 = vpop.f32.mrf.mxu0 }
 0x4ad   :  { %1283 = vst [vmem:[#allocation10 + $0x88] sm:$0xff] %v1207_v28  ;;  %v1615_v30 = vadd.f32 %v1614_v29, %v1613_v27 }
 0x4ae   :  { %v1616_v32 = vpop.f32.mrf.mxu0 }
 0x4af   :  { %v1212_v33 = vadd.f32 %v1615_v30, %v2187_v18 }
 0x4b0   :  { %v1617_v36 = vpop.f32.mrf.mxu0 }
 0x4b1   :  { %1284 = vst [vmem:[#allocation10 + $0x90] sm:$0xff] %v1212_v33  ;;  %v1618_v37 = vadd.f32 %v1617_v36, %v1616_v32 }
 0x4b2   :  { %v1619_v40 = vpop.f32.mrf.mxu0 }
 0x4b3   :  { %v1215_v41 = vadd.f32 %v1618_v37, %v2187_v18 }
 0x4b4   :  { %v1620_v42 = vpop.f32.mrf.mxu0 }
 0x4b5   :  { %1285 = vst [vmem:[#allocation10 + $0x98] sm:$0xff] %v1215_v41  ;;  %v1621_v43 = vadd.f32 %v1620_v42, %v1619_v40 }
 0x4b6   :  { %v1622_v44 = vpop.f32.mrf.mxu0 }
 0x4b7   :  { %v1220_v45 = vadd.f32 %v1621_v43, %v2187_v18 }
 0x4b8   :  { %v1623_v46 = vpop.f32.mrf.mxu0 }
 0x4b9   :  { %1286 = vst [vmem:[#allocation10 + $0xa0] sm:$0xff] %v1220_v45  ;;  %v1624_v47 = vadd.f32 %v1623_v46, %v1622_v44 }
 0x4ba   :  { %v1625_v48 = vpop.f32.mrf.mxu0 }
 0x4bb   :  { %v1223_v10 = vadd.f32 %v1624_v47, %v2187_v18 }
 0x4bc   :  { %v1626_v31 = vpop.f32.mrf.mxu0 }
 0x4bd   :  { %1287 = vst [vmem:[#allocation10 + $0xa8] sm:$0xff] %v1223_v10  ;;  %v1627_v39 = vadd.f32 %v1626_v31, %v1625_v48 }
 0x4be   :  { %v1628_v50 = vpop.f32.mrf.mxu0 }
 0x4bf   :  { %v1228_v51 = vadd.f32 %v1627_v39, %v2187_v18 }
 0x4c0   :  { %v1629_v53 = vpop.f32.mrf.mxu0 }
 0x4c1   :  { %1288 = vst [vmem:[#allocation10 + $0xb0] sm:$0xff] %v1228_v51  ;;  %v1630_v52 = vadd.f32 %v1629_v53, %v1628_v50 }
 0x4c2   :  { %v1631_v54 = vpop.f32.mrf.mxu0 }
 0x4c3   :  { %v1231_v56 = vadd.f32 %v1630_v52, %v2187_v18 }
 0x4c4   :  { %v1632_v24 = vpop.f32.mrf.mxu0 }
 0x4c5   :  { %1289 = vst [vmem:[#allocation10 + $0xb8] sm:$0xff] %v1231_v56  ;;  %v1633_v58 = vadd.f32 %v1632_v24, %v1631_v54 }
 0x4c6   :  { %v1634_v59 = vpop.f32.mrf.mxu0 }
 0x4c7   :  { %v1236_v60 = vadd.f32 %v1633_v58, %v2187_v18 }
 0x4c8   :  { %v1635_v61 = vpop.f32.mrf.mxu0 }
 0x4c9   :  { %1290 = vst [vmem:[#allocation10 + $0xc0] sm:$0xff] %v1236_v60  ;;  %v1636_v62 = vadd.f32 %v1635_v61, %v1634_v59 }
 0x4ca   :  { %v1637_v63 = vpop.f32.mrf.mxu0 }
 0x4cb   :  { %v1239_v0 = vadd.f32 %v1636_v62, %v2187_v18 }
 0x4cc   :  { %v1638_v1 = vpop.f32.mrf.mxu0 }
 0x4cd   :  { %1291 = vst [vmem:[#allocation10 + $0xc8] sm:$0xff] %v1239_v0  ;;  %v1639_v2 = vadd.f32 %v1638_v1, %v1637_v63 }
 0x4ce   :  { %v1640_v3 = vpop.f32.mrf.mxu0 }
 0x4cf   :  { %v1244_v4 = vadd.f32 %v1639_v2, %v2187_v18 }
 0x4d0   :  { %v1641_v5 = vpop.f32.mrf.mxu0 }
 0x4d1   :  { %1292 = vst [vmem:[#allocation10 + $0xd0] sm:$0xff] %v1244_v4  ;;  %v1642_v6 = vadd.f32 %v1641_v5, %v1640_v3 }
 0x4d2   :  { %v1643_v7 = vpop.f32.mrf.mxu0 }
 0x4d3   :  { %v1247_v8 = vadd.f32 %v1642_v6, %v2187_v18 }
 0x4d4   :  { %v1644_v9 = vpop.f32.mrf.mxu0 }
 0x4d5   :  { %1293 = vst [vmem:[#allocation10 + $0xd8] sm:$0xff] %v1247_v8  ;;  %v1645_v12 = vadd.f32 %v1644_v9, %v1643_v7 }
 0x4d6   :  { %v1646_v34 = vpop.f32.mrf.mxu0 }
 0x4d7   :  { %v1252_v35 = vadd.f32 %v1645_v12, %v2187_v18 }
 0x4d8   :  { %v1647_v38 = vpop.f32.mrf.mxu0 }
 0x4d9   :  { %1294 = vst [vmem:[#allocation10 + $0xe0] sm:$0xff] %v1252_v35  ;;  %v1648_v49 = vadd.f32 %v1647_v38, %v1646_v34 }
 0x4da   :  { %v1649_v55 = vpop.f32.mrf.mxu0 }
 0x4db   :  { %v1255_v57 = vadd.f32 %v1648_v49, %v2187_v18 }
 0x4dc   :  { %v1650_v11 = vpop.f32.mrf.mxu0 }
 0x4dd   :  { %1295 = vst [vmem:[#allocation10 + $0xe8] sm:$0xff] %v1255_v57  ;;  %v1651_v13 = vadd.f32 %v1650_v11, %v1649_v55 }
 0x4de   :  { %v1652_v14 = vpop.f32.mrf.mxu0 }
 0x4df   :  { %v1260_v15 = vadd.f32 %v1651_v13, %v2187_v18 }
 0x4e0   :  { %v1653_v16 = vpop.f32.mrf.mxu0 }
 0x4e1   :  { %1296 = vst [vmem:[#allocation10 + $0xf0] sm:$0xff] %v1260_v15  ;;  %v1654_v17 = vadd.f32 %v1653_v16, %v1652_v14 }
 0x4e3   :  { %v1263_v19 = vadd.f32 %v1654_v17, %v2187_v18 }
 0x4e5   :  { %1297 = vst [vmem:[#allocation10 + $0xf8] sm:$0xff] %v1263_v19 }
 0x4e6   :  { %1931 = shalt.err (!%p1928_p10)
}
 0x4e7   :  { %1309 = dma.vmem_to_hbm [thread:$0]  %s1304_s20, 4096, %s2233_s6, [#allocation4], %s1949_s24, %s1949_s24, %s1950_s25  }
 0x4e8   :  { %1946 = dma.done.wait [#allocation4], 4096  }
 0x4e9   :  { %1947 = vsyncadd [#allocation4], 4294963200 }
 0x4ea   :  { %1313 = vsyncpa [#allocation3], 1 }
 0x4eb   :  { %1314 = vsyncpa [#allocation6], 1 }
 0x4ec   :  { %1315 = vsyncpa [#allocation9], 1 }
 0x4ed   :  { %1316 = vsyncpa [#allocation4], 1 }

</bundles_post_ra>
